<compile_context>
chip_gen: v7x
topology: tpu7x:2x2x1
jax: 0.10.0
libtpu: 0.0.40
codegen_flags: <defaults>
</compile_context>

<pallas_src>
import functools

import jax
import jax.numpy as jnp
from jax.experimental import pallas as pl
from jax.experimental.pallas import tpu as pltpu

_SUBLANE_BF16 = 16             # rows per sublane-packed bf16 tile (also ok for f32)
_VMEM_LIMIT_BYTES = 32 << 20   # explicit scoped-VMEM limit (safe on v5e/v6e/v7x)
_VMEM_TILE_FRACTION = 0.75     # keep the tile plan under 75% of the limit


def _round_up(x, m):
    return ((x + m - 1) // m) * m


def _patch_proj_kernel(x_ref, w_ref, b_ref, o_ref):
    # x_ref: (TM, K) streamed tile of flattened patches (bf16 by default)
    # w_ref: (K,  E) projection weight, VMEM-resident across the grid
    # b_ref: (1,  E) bias (f32), VMEM-resident
    # o_ref: (TM, E)
    acc = jnp.dot(x_ref[...], w_ref[...], preferred_element_type=jnp.float32)
    o_ref[...] = (acc + b_ref[...].astype(jnp.float32)).astype(o_ref.dtype)


def _pick_tm(M, K, E, requested_tm, x_itemsize, w_itemsize, out_itemsize):
    """Tile over M: >= 4 grid steps when possible, 16-row aligned, VMEM-capped."""
    tm = max(_SUBLANE_BF16,
             min(requested_tm, _round_up(pl.cdiv(M, 4), _SUBLANE_BF16)))
    # Budget: double-buffered x tile + double-buffered out tile + (worst-case
    # double-buffered) weight + bias must fit in a fraction of the VMEM limit.
    budget = int(_VMEM_LIMIT_BYTES * _VMEM_TILE_FRACTION)
    budget -= 2 * K * E * w_itemsize + 2 * E * 4
    per_row = 2 * K * x_itemsize + 2 * E * out_itemsize
    if budget > 0 and per_row > 0:
        cap = max(_SUBLANE_BF16,
                  (budget // per_row) // _SUBLANE_BF16 * _SUBLANE_BF16)
        tm = min(tm, cap)
    return tm


def _patch_proj(x_flat, w_flat, b_row, out_dtype, tm, single_buffer_params):
    """(M, K) @ (K, E) + bias -> (M, E); M tiles stream, weight stays resident."""
    M, K = x_flat.shape
    E = w_flat.shape[1]
    out_itemsize = jnp.dtype(out_dtype).itemsize
    tm = _pick_tm(M, K, E, tm, x_flat.dtype.itemsize, w_flat.dtype.itemsize,
                  out_itemsize)

    # Grid-invariant blocks: request single buffering (they never re-DMA).
    resident = dict(pipeline_mode=pl.Buffered(1)) if single_buffer_params else {}

    cost = pl.CostEstimate(
        flops=2 * M * K * E,
        transcendentals=0,
        bytes_accessed=(M * K * x_flat.dtype.itemsize
                        + K * E * w_flat.dtype.itemsize
                        + E * b_row.dtype.itemsize
                        + M * E * out_itemsize),
    )

    return pl.pallas_call(
        _patch_proj_kernel,
        out_shape=jax.ShapeDtypeStruct((M, E), out_dtype),
        grid_spec=pltpu.PrefetchScalarGridSpec(
            num_scalar_prefetch=0,
            grid=(pl.cdiv(M, tm),),          # ragged last block is masked by Pallas
            in_specs=[
                pl.BlockSpec((tm, K), lambda i: (i, 0)),              # streamed patches
                pl.BlockSpec((K, E), lambda i: (0, 0), **resident),   # resident weight
                pl.BlockSpec((1, E), lambda i: (0, 0), **resident),   # resident bias
            ],
            out_specs=pl.BlockSpec((tm, E), lambda i: (i, 0)),
        ),
        compiler_params=pltpu.CompilerParams(
            # Independent M tiles -> shard across TensorCores (v7x megacore).
            dimension_semantics=("parallel",),
            vmem_limit_bytes=_VMEM_LIMIT_BYTES,
            # Allow XLA to fuse the patch transpose/reshape/cast producer into
            # the x operand instead of materialising an extra HBM copy.
            allow_input_fusion=[True, False, False],
        ),
        cost_estimate=cost,
    )(x_flat, w_flat, b_row)


def patch_embedding_forward(x, w_flat, b_row, *, patch_size, compute_dtype,
                            out_dtype, tm, single_buffer_params):
    """x: (B, C, H, W) NCHW -> (B, num_patches, embed_dim)."""
    B, C, H, W = x.shape
    P = patch_size
    assert H % P == 0 and W % P == 0
    nh, nw = H // P, W // P
    num_patches = nh * nw
    K = C * P * P
    E = w_flat.shape[1]

    # Extract patches, flatten each in (C, kh, kw) order (conv-weight order):
    # (B, C, nh, P, nw, P) -> (B, nh, nw, C, P, P) -> (B*num_patches, K).
    # With allow_input_fusion on the pallas_call this producer can fuse into
    # the kernel operand instead of costing an extra HBM pass.
    # TODO(synk): if profiles show the transpose still materialises, move the
    # patch rearrangement into the kernel (grid over (B,), full-image block).
    x_p = jnp.transpose(x.reshape(B, C, nh, P, nw, P), (0, 2, 4, 1, 3, 5))
    x_flat = x_p.reshape(B * num_patches, K)
    if compute_dtype is not None and x_flat.dtype != compute_dtype:
        x_flat = x_flat.astype(compute_dtype)

    od = x.dtype if out_dtype is None else out_dtype
    out = _patch_proj(x_flat, w_flat, b_row, od, tm, single_buffer_params)
    return out.reshape(B, num_patches, E)


class PatchEmbedding:
    """JAX/Pallas equivalent of the PyTorch PatchEmbedding module."""

    def __init__(self, image_size=16, patch_size=4, in_channels=4, embed_dim=32,
                 key=None, compute_dtype=jnp.bfloat16, out_dtype=None, tm=512):
        self.image_size = image_size
        self.patch_size = patch_size
        self.in_channels = in_channels
        self.embed_dim = embed_dim
        self.num_patches = (image_size // patch_size) ** 2

        if key is None:
            key = jax.random.PRNGKey(0)
        k_w, k_b = jax.random.split(key)
        fan_in = in_channels * patch_size * patch_size
        bound = 1.0 / (fan_in ** 0.5)
        # Deterministic init mimicking nn.Conv2d default (uniform +-1/sqrt(fan_in)).
        self.weight = jax.random.uniform(
            k_w, (embed_dim, in_channels, patch_size, patch_size),
            dtype=jnp.float32, minval=-bound, maxval=bound)
        self.bias = jax.random.uniform(
            k_b, (embed_dim,), dtype=jnp.float32, minval=-bound, maxval=bound)

        # Flatten the conv weight to (K, E) once at init and keep it in the MXU
        # compute dtype (bf16 by default) so no per-call cast / transpose is needed.
        K = in_channels * patch_size * patch_size
        w_flat = self.weight.reshape(embed_dim, K).T                    # (K, E)
        self.w_flat = w_flat if compute_dtype is None else w_flat.astype(compute_dtype)
        self.b_row = self.bias.reshape(1, embed_dim)  # bias stays f32 (added post-MXU)

        common = dict(patch_size=patch_size, compute_dtype=compute_dtype,
                      out_dtype=out_dtype, tm=tm)
        self._fwd_single_buf = jax.jit(functools.partial(
            patch_embedding_forward, single_buffer_params=True, **common))
        self._fwd_double_buf = jax.jit(functools.partial(
            patch_embedding_forward, single_buffer_params=False, **common))
        self._use_single_buf = True

    def __call__(self, x):
        B, C, H, W = x.shape
        assert H == self.image_size and W == self.image_size, (
            f"input image size ({H}*{W}) does not match model "
            f"({self.image_size}*{self.image_size})")
        if self._use_single_buf:
            try:
                return self._fwd_single_buf(x, self.w_flat, self.b_row)
            except Exception:
                # Fallback if this JAX build rejects pl.Buffered(1) on the
                # implicit pallas_call pipeline; everything else is identical.
                self._use_single_buf = False
        return self._fwd_double_buf(x, self.w_flat, self.b_row)


def _reference_forward(x, weight, bias, patch_size):
    """Pure-JAX reference (conv via lax.conv_general_dilated) for validation."""
    out = jax.lax.conv_general_dilated(
        x, weight,
        window_strides=(patch_size, patch_size),
        padding="VALID",
        dimension_numbers=("NCHW", "OIHW", "NCHW"),
    ) + bias.reshape(1, -1, 1, 1)
    B, E, nh, nw = out.shape
    return jnp.transpose(out.reshape(B, E, nh * nw), (0, 2, 1))


if __name__ == "__main__":
    # Small shapes consistent with the module: batch=2, channels=4,
    # spatial=16, patch=4 -> 16 patches, embed_dim=32.
    key = jax.random.PRNGKey(0)
    k_x, k_m = jax.random.split(key)

    B, C, H, W = 2, 4, 16, 16
    x = jax.random.normal(k_x, (B, C, H, W), dtype=jnp.float32)

    model = PatchEmbedding(image_size=16, patch_size=4, in_channels=4,
                           embed_dim=32, key=k_m)

    out = jax.block_until_ready(model(x))

    ref = _reference_forward(x, model.weight, model.bias, model.patch_size)
    assert out.shape == (B, model.num_patches, model.embed_dim), out.shape
    # bf16 inputs (f32 MXU accumulation) -> slightly looser agreement with the
    # all-f32 conv reference than the previous f32-only path.
    assert jnp.allclose(out.astype(jnp.float32), ref, atol=1e-2, rtol=1e-2), (
        "mismatch vs reference")

    print("KERNEL_OK")
</pallas_src>

<mosaic_0001>
module attributes {stable_mosaic.version = 11 : i64} {
  func.func @_patch_proj_kernel(%arg0: i32, %arg1: memref<16x64xbf16, #tpu.memory_space<vmem>>, %arg2: memref<64x32xbf16, #tpu.memory_space<vmem>>, %arg3: memref<1x32xf32, #tpu.memory_space<vmem>>, %arg4: memref<16x32xf32, #tpu.memory_space<vmem>>) attributes {dimension_semantics = [#tpu.dimension_semantics<parallel>], iteration_bounds = array<i64: 2>, scalar_prefetch = 0 : i64, scratch_operands = 0 : i64, tpu.core_type = #tpu.core_type<tc>, window_params = [{transform_indices = @transform_0, window_bounds = array<i64: 16, 64>}, {pipeline_mode = #tpu.pipeline_mode<synchronous>, transform_indices = @transform_1, window_bounds = array<i64: 64, 32>}, {pipeline_mode = #tpu.pipeline_mode<synchronous>, transform_indices = @transform_2, window_bounds = array<i64: 1, 32>}, {transform_indices = @transform_3, window_bounds = array<i64: 16, 32>}]} {
    %c0 = arith.constant 0 : index
    %c0_0 = arith.constant 0 : index
    %0 = vector.load %arg1[%c0, %c0_0] : memref<16x64xbf16, #tpu.memory_space<vmem>>, vector<16x64xbf16>
    %c0_1 = arith.constant 0 : index
    %c0_2 = arith.constant 0 : index
    %1 = vector.load %arg2[%c0_1, %c0_2] : memref<64x32xbf16, #tpu.memory_space<vmem>>, vector<64x32xbf16>
    %cst = arith.constant dense<0.000000e+00> : vector<16x32xf32>
    %2 = tpu.matmul %0, %1, %cst {dimension_numbers = #tpu.dot_dimension_numbers<[1], [0], [0], [1], [0, 0, 1, 1], [], []>} : vector<16x64xbf16>, vector<64x32xbf16>, vector<16x32xf32> -> vector<16x32xf32>
    %c0_3 = arith.constant 0 : index
    %c0_4 = arith.constant 0 : index
    %3 = vector.load %arg3[%c0_3, %c0_4] : memref<1x32xf32, #tpu.memory_space<vmem>>, vector<1x32xf32>
    %4 = vector.broadcast %3 : vector<1x32xf32> to vector<16x32xf32>
    %5 = arith.addf %2, %4 : vector<16x32xf32>
    %c0_5 = arith.constant 0 : index
    %c0_6 = arith.constant 0 : index
    %6 = vector.load %arg4[%c0_5, %c0_6] : memref<16x32xf32, #tpu.memory_space<vmem>>, vector<16x32xf32>
    tpu.vector_store %arg4[%c0_5, %c0_6], %5 {strides = array<i32>} : memref<16x32xf32, #tpu.memory_space<vmem>>, vector<16x32xf32>,
    return
  }
  func.func @transform_0(%arg0: i32) -> (i32, i32) {
    %c0_i32 = arith.constant 0 : i32
    %c0_i32_0 = arith.constant 0 : i32
    return %arg0, %c0_i32 : i32, i32
  }
  func.func @transform_1(%arg0: i32) -> (i32, i32) {
    %c0_i32 = arith.constant 0 : i32
    %c0_i32_0 = arith.constant 0 : i32
    %c0_i32_1 = arith.constant 0 : i32
    return %c0_i32, %c0_i32_0 : i32, i32
  }
  func.func @transform_2(%arg0: i32) -> (i32, i32) {
    %c0_i32 = arith.constant 0 : i32
    %c0_i32_0 = arith.constant 0 : i32
    %c0_i32_1 = arith.constant 0 : i32
    return %c0_i32, %c0_i32_0 : i32, i32
  }
  func.func @transform_3(%arg0: i32) -> (i32, i32) {
    %c0_i32 = arith.constant 0 : i32
    %c0_i32_0 = arith.constant 0 : i32
    return %arg0, %c0_i32 : i32, i32
  }
}

module attributes {stable_mosaic.version = 11 : i64} {
  func.func @_patch_proj_kernel(%arg0: i32, %arg1: memref<16x64xbf16, #tpu.memory_space<vmem>>, %arg2: memref<64x32xbf16, #tpu.memory_space<vmem>>, %arg3: memref<1x32xf32, #tpu.memory_space<vmem>>, %arg4: memref<16x32xf32, #tpu.memory_space<vmem>>) attributes {dimension_semantics = [#tpu.dimension_semantics<parallel>], iteration_bounds = array<i64: 2>, scalar_prefetch = 0 : i64, scratch_operands = 0 : i64, tpu.core_type = #tpu.core_type<tc>, window_params = [{transform_indices = @transform_0, window_bounds = array<i64: 16, 64>}, {pipeline_mode = #tpu.pipeline_mode<synchronous>, transform_indices = @transform_1, window_bounds = array<i64: 64, 32>}, {pipeline_mode = #tpu.pipeline_mode<synchronous>, transform_indices = @transform_2, window_bounds = array<i64: 1, 32>}, {transform_indices = @transform_3, window_bounds = array<i64: 16, 32>}]} {
    %c0 = arith.constant 0 : index
    %c0_0 = arith.constant 0 : index
    %0 = vector.load %arg1[%c0, %c0_0] : memref<16x64xbf16, #tpu.memory_space<vmem>>, vector<16x64xbf16>
    %c0_1 = arith.constant 0 : index
    %c0_2 = arith.constant 0 : index
    %1 = vector.load %arg2[%c0_1, %c0_2] : memref<64x32xbf16, #tpu.memory_space<vmem>>, vector<64x32xbf16>
    %cst = arith.constant dense<0.000000e+00> : vector<16x32xf32>
    %2 = tpu.matmul %0, %1, %cst {dimension_numbers = #tpu.dot_dimension_numbers<[1], [0], [0], [1], [0, 0, 1, 1], [], []>} : vector<16x64xbf16>, vector<64x32xbf16>, vector<16x32xf32> -> vector<16x32xf32>
    %c0_3 = arith.constant 0 : index
    %c0_4 = arith.constant 0 : index
    %3 = vector.load %arg3[%c0_3, %c0_4] : memref<1x32xf32, #tpu.memory_space<vmem>>, vector<1x32xf32>
    %4 = vector.broadcast %3 : vector<1x32xf32> to vector<16x32xf32>
    %5 = arith.addf %2, %4 : vector<16x32xf32>
    %c0_5 = arith.constant 0 : index
    %c0_6 = arith.constant 0 : index
    %6 = vector.load %arg4[%c0_5, %c0_6] : memref<16x32xf32, #tpu.memory_space<vmem>>, vector<16x32xf32>
    tpu.vector_store %arg4[%c0_5, %c0_6], %5 {strides = array<i32>} : memref<16x32xf32, #tpu.memory_space<vmem>>, vector<16x32xf32>,
    return
  }
  func.func @transform_0(%arg0: i32) -> (i32, i32) {
    %c0_i32 = arith.constant 0 : i32
    %c0_i32_0 = arith.constant 0 : i32
    return %arg0, %c0_i32 : i32, i32
  }
  func.func @transform_1(%arg0: i32) -> (i32, i32) {
    %c0_i32 = arith.constant 0 : i32
    %c0_i32_0 = arith.constant 0 : i32
    %c0_i32_1 = arith.constant 0 : i32
    return %c0_i32, %c0_i32_0 : i32, i32
  }
  func.func @transform_2(%arg0: i32) -> (i32, i32) {
    %c0_i32 = arith.constant 0 : i32
    %c0_i32_0 = arith.constant 0 : i32
    %c0_i32_1 = arith.constant 0 : i32
    return %c0_i32, %c0_i32_0 : i32, i32
  }
  func.func @transform_3(%arg0: i32) -> (i32, i32) {
    %c0_i32 = arith.constant 0 : i32
    %c0_i32_0 = arith.constant 0 : i32
    return %arg0, %c0_i32 : i32, i32
  }
}

</mosaic_0001>

<bundles_post_ra>
// kernel: patch_embedding_forward.1
= control target key start
LH: loop header
LB: loop body
LE: loop exit
PB: predicated region body
PF: predicated region fallthrough
CT: control target
= control target key end

     0   :  { %8 = vsyncpa [#allocation3], 0  ;;  %s634_s0 = inlined_call_operand.vmem [shape: bf16[32,64], index: 0, kind: input, shape index: {}]   ;;  %s635_s1 = inlined_call_operand.vmem [shape: bf16[64,32], index: 1, kind: input, shape index: {}]   ;;  %s636_s2 = inlined_call_operand.vmem [shape: f32[1,32], index: 2, kind: input, shape index: {}]   ;;  %s637_s3 = inlined_call_operand.hbm [shape: f32[32,32], index: 3, kind: output, shape index: {}]  }
   0x1   :  { %10 = vsyncpa [#allocation3 + $0x1], 0  ;;  %s517_s12 = smov 0   ;;  %s519_s13 = smov 0  }
   0x2   :  { %s521_s14 = smov 0   ;;  %s523_s15 = smov 0  }
   0x3 LB: > { %s538_s16 = sadd.s32 4294967295, %s490_s15   ;;  %s343_s17 = sadd.s32 4294967294, %s490_s15   ;;  %s490_s15 = sphi %s523_s15, %s643_s15   ;;  %s486_s14 = sphi %s521_s14, %s642_s14   ;;  %s482_s13 = sphi %s519_s13, %s641_s13   ;;  %s478_s12 = sphi %s517_s12, %s640_s12  }
   0x4   : > { %s542_s18 = sadd.s32 1, %s490_s15   ;;  %s91_s19 = sadd.s32 1, %s486_s14 }
   0x5   : > { %s88_s20 = ssub.s32 %s490_s15, %s542_s18  ;;  %p101_p0 = scmp.ne.s32.totalorder %s486_s14, %s482_s13 }
   0x6   : > { %p89_p1 = scmp.eq.s32.totalorder %s88_s20, 0  ;;  %p102_p2 = scmp.eq.s32.totalorder %s538_s16, 1 }
   0x7   : > { %p107_p3 = scmp.ne.s32.totalorder %s482_s13, %s478_s12  ;;  %p108_p4 = scmp.eq.s32.totalorder %s343_s17, 1 }
   0x8   : > { %s553_s21 = scalar_select %p89_p1, %s486_s14, %s91_s19  }
   0x9   : > { %p555_p5 = por %p102_p2, %p101_p0  ;;  %p559_p6 = por %p108_p4, %p107_p3 }
   0xa   : > { %p346_p7 = scmp.ge.s32.totalorder %s490_s15, 1  ;;  %p141_p8 = scmp.lt.s32.totalorder %s490_s15, 3 }
   0xc   : > { %p142_p9 = pnand %p346_p7, %p141_p8 }
   0xd   : > { %v423_v0 = vld [vmem:[%s635_s1] sm:$0xff] (!%p142_p9)   ;;  %v492_v1 = vmov (!%p142_p9), 0.0   ;;  %v424_v2 = vld [vmem:[%s635_s1 + $0x8] sm:$0xff] (!%p142_p9)   ;;  %vm493_vm0 = vmmov (!%p142_p9), 0   ;;  %s348_s28 = sshll.u32 (!%p142_p9), %s538_s16, 1  ;;  %v425_v3 = vld [vmem:[%s635_s1 + $0x10] sm:$0xff] (!%p142_p9)  }
   0xe   : > { %145 = sbr.rel (%p142_p9) target bundleno = 261 (0x105), region = 32  ;;  %368 = vmatprep.subr.bf16.mxu0 (!%p142_p9), %v492_v1  ;;  %376 = vmatprep.mubr.msk.bf16.mxu0 (!%p142_p9), %vm493_vm0, %v492_v1  ;;  %p166_p10 = scmp.lt.s32.totalorder (!%p142_p9), %s348_s28, 3  ;;  %v426_v4 = vld [vmem:[%s635_s1 + $0x18] sm:$0xff] (!%p142_p9)   ;;  %vm219_vm1 = vcmask (!%p142_p9), 523264   ;;  %v350_v6 = vld [vmem:[%s636_s2] ss:$0 sm:$0xff] (!%p142_p9) }
   0xf   : > { %369 = vmatpush3.bf16.msra.mxu0 (!%p142_p9), %v423_v0  ;;  %s162_s10 = sand.u32 (!%p142_p9), 1, %s482_s13   ;;  %s362_s25 = sshll.u32 (!%p142_p9), %s538_s16, 8  ;;  %vm264_vm2 = vcmask (!%p142_p9), 261120  }
  0x10   : > { %370 = vmatprep.subr.bf16.mxu0 (!%p142_p9), %v492_v1  ;;  %s347_s11 = sshll.u32 (!%p142_p9), %s162_s10, 4  ;;  %s593_s16 = scalar_lea.sflag (!%p142_p9), [#allocation3], %s162_s10 }
  0x11   : > { %s164_s20 = scalar_lea.vmem (!%p142_p9), [#allocation2], %s347_s11  ;;  %s494_s30 = smov (!%p142_p9), [#allocation2]  }
  0x12   : > { %s281_s24 = sshll.u32 (!%p142_p9), %s164_s20, 4  ;;  %s586_s24 = int_to_ptr.vmem [resolvable:$true] %s281_s24 }
  0x13   : > { %371 = vmatpush3.bf16.msra.mxu0 (!%p142_p9), %v424_v2  ;;  %s428_s29 = scalar_lea.vmem (!%p142_p9), %s586_s24, 256 }
  0x14   : > { %372 = vmatprep.subr.bf16.mxu0 (!%p142_p9), %v492_v1  ;;  %p429_p11 = scmp.ne.s32.totalorder (!%p142_p9), %s586_s24, %s428_s29 }
  0x15   : > { %s645_s28 = smov (!%p166_p10, %s348_s28), 3 }
  0x16   : > { %s349_s4 = sshll.u32 %s645_s28, 2  ;;  %s591_s28 = scalar_lea.hbm %s637_s3, %s362_s25 }
  0x17   : > { %s169_s7 = scalar_lea.vmem %s634_s0, %s349_s4  ;;  %373 = vmatpush3.bf16.msra.mxu0 %v425_v3  ;;  %p430_p12 = pnand %p429_p11, %p555_p5 }
  0x18   : > { %374 = vmatprep.subr.bf16.mxu0 %v492_v1  ;;  %v427_v5 = vld [vmem:[%s169_s7] sm:$0xff]   ;;  %s432_s4 = sshll.u32 %s494_s30, 4  ;;  %s433_s4 = int_to_ptr.vmem [resolvable:$false] %s432_s4 }
  0x19   : > { %p431_p13 = pneg %p430_p12  ;;  %s434_s5 = scalar_lea.vmem %s433_s4, 512 }
  0x1a   : > { %p435_p0 = scmp.lt.s32.totalorder %s586_s24, %s433_s4  ;;  %p436_p1 = scmp.lt.s32.totalorder %s434_s5, %s428_s29 }
  0x1b   : > { %375 = vmatpush3.bf16.msra.mxu0 %v426_v4 }
  0x1c   : > { %p437_p2 = por %p436_p1, %p435_p0 }
  0x1e   : > { %377 = vmatmul.mubr.msk.bf16.vlgmr.msra.gmra.mrb[0].mxu0 %vm219_vm1, %v427_v5  ;;  %p438_p3 = pnand %p437_p2, %p431_p13 }
  0xf1   : > { %v257_v7 = vpop.f32.mrb[0].mxu0 }
  0xf2   : > { %v258_v8 = vadd.f32 %v350_v6, %v257_v7  ;;  %v378_v9 = vpop.f32.mrb[1].mxu0 }
  0xf3   : > { %v260_v10 = vpop.f32.mrb[2].mxu0 }
  0xf4   : > { %265 = vst.msk [vmem:[%s164_s20] sm:$0xff] %vm264_vm2, %v258_v8  ;;  %v261_v11 = vadd.f32 %v350_v6, %v260_v10  ;;  %v379_v12 = vpop.f32.mrb[3].mxu0 }
  0xf6   : > { %266 = vst.msk [vmem:[%s164_s20 + $0x8] sm:$0xff] %vm264_vm2, %v261_v11 }
  0xf7   : > { %441 = shalt.err (!%p438_p3)
}
  0xf8   : > { %s442_s6 = scalar_lea.hbm %s591_s28, 256  ;;  %s446_s9 = scalar_lea.hbm %s637_s3, 512 }
  0xf9   : > { %p443_p4 = scmp.ne.s32.totalorder %s591_s28, %s442_s6  ;;  %p447_p9 = scmp.lt.u32.totalorder %s591_s28, %s637_s3 }
  0xfa   : > { %p448_p10 = scmp.lt.u32.totalorder %s446_s9, %s442_s6  ;;  %p450_p12 = scmp.lt.u32.totalorder %s442_s6, %s591_s28 }
  0xfb   : > { %p444_p7 = pnand %p443_p4, %p555_p5 }
  0xfc   : > { %p449_p11 = por %p448_p10, %p447_p9 }
  0xfd   : > { %p445_p8 = pneg %p444_p7 }
  0xfe   : > { %p451_p13 = por %p450_p12, %p449_p11 }
 0x100   : > { %p452_p0 = pnand %p451_p13, %p445_p8 }
 0x102   : > { %455 = shalt.err (!%p452_p0)
}
 0x103   : > { %s495_s17 = smov 128   ;;  %s496_s19 = smov 8  }
 0x104   : > { %380 = dma.vmem_to_hbm [thread:$0]  (%p555_p5), %s586_s24, 256, %s591_s28, %s593_s16, %s495_s17, %s495_s17, %s496_s19  }
 0x105 PF: > { %p386_p1 = scmp.ge.s32.totalorder %s490_s15, 2  ;;  %s296_s20 = sand.u32 1, %s478_s12  }
 0x106   : > { %s297_s25 = scalar_lea.sflag [#allocation3], %s296_s20 }
 0x107   : > { %p383_p2 = pnand %p386_p1, %p559_p6 }
 0x109   : > { %473 = dma.done.wait (!%p383_p2), %s297_s25, 256  }
 0x10a   : > { %475 = vsyncadd (!%p383_p2), %s297_s25, 4294967040  ;;  %p13_p3 = scmp.ge.s32.totalorder %s542_s18, 4   ;;  %s640_s12 = smov %s482_s13 }
 0x10b   : > { %s641_s13 = smov %s486_s14  ;;  %s642_s14 = smov %s553_s21 }
 0x10c   : > { %s643_s15 = smov %s542_s18  ;;  %15 = sbr.rel (!%p13_p3) target bundleno = 3 (0x3), region = 67 }
 0x113   :  { %302 = vsyncpa [#allocation3], 1 }
 0x114   :  { %304 = vsyncpa [#allocation3 + $0x1], 1 }

// kernel: patch_embedding_forward.1
= control target key start
LH: loop header
LB: loop body
LE: loop exit
PB: predicated region body
PF: predicated region fallthrough
CT: control target
= control target key end

     0   :  { %8 = vsyncpa [#allocation3], 0  ;;  %s634_s0 = inlined_call_operand.vmem [shape: bf16[32,64], index: 0, kind: input, shape index: {}]   ;;  %s635_s1 = inlined_call_operand.vmem [shape: bf16[64,32], index: 1, kind: input, shape index: {}]   ;;  %s636_s2 = inlined_call_operand.vmem [shape: f32[1,32], index: 2, kind: input, shape index: {}]   ;;  %s637_s3 = inlined_call_operand.hbm [shape: f32[32,32], index: 3, kind: output, shape index: {}]  }
   0x1   :  { %10 = vsyncpa [#allocation3 + $0x1], 0  ;;  %s517_s12 = smov 0   ;;  %s519_s13 = smov 0  }
   0x2   :  { %s521_s14 = smov 0   ;;  %s523_s15 = smov 0  }
   0x3 LB: > { %s538_s16 = sadd.s32 4294967295, %s490_s15   ;;  %s343_s17 = sadd.s32 4294967294, %s490_s15   ;;  %s490_s15 = sphi %s523_s15, %s643_s15   ;;  %s486_s14 = sphi %s521_s14, %s642_s14   ;;  %s482_s13 = sphi %s519_s13, %s641_s13   ;;  %s478_s12 = sphi %s517_s12, %s640_s12  }
   0x4   : > { %s542_s18 = sadd.s32 1, %s490_s15   ;;  %s91_s19 = sadd.s32 1, %s486_s14 }
   0x5   : > { %s88_s20 = ssub.s32 %s490_s15, %s542_s18  ;;  %p101_p0 = scmp.ne.s32.totalorder %s486_s14, %s482_s13 }
   0x6   : > { %p89_p1 = scmp.eq.s32.totalorder %s88_s20, 0  ;;  %p102_p2 = scmp.eq.s32.totalorder %s538_s16, 1 }
   0x7   : > { %p107_p3 = scmp.ne.s32.totalorder %s482_s13, %s478_s12  ;;  %p108_p4 = scmp.eq.s32.totalorder %s343_s17, 1 }
   0x8   : > { %s553_s21 = scalar_select %p89_p1, %s486_s14, %s91_s19  }
   0x9   : > { %p555_p5 = por %p102_p2, %p101_p0  ;;  %p559_p6 = por %p108_p4, %p107_p3 }
   0xa   : > { %p346_p7 = scmp.ge.s32.totalorder %s490_s15, 1  ;;  %p141_p8 = scmp.lt.s32.totalorder %s490_s15, 3 }
   0xc   : > { %p142_p9 = pnand %p346_p7, %p141_p8 }
   0xd   : > { %v423_v0 = vld [vmem:[%s635_s1] sm:$0xff] (!%p142_p9)   ;;  %v492_v1 = vmov (!%p142_p9), 0.0   ;;  %v424_v2 = vld [vmem:[%s635_s1 + $0x8] sm:$0xff] (!%p142_p9)   ;;  %vm493_vm0 = vmmov (!%p142_p9), 0   ;;  %s348_s28 = sshll.u32 (!%p142_p9), %s538_s16, 1  ;;  %v425_v3 = vld [vmem:[%s635_s1 + $0x10] sm:$0xff] (!%p142_p9)  }
   0xe   : > { %145 = sbr.rel (%p142_p9) target bundleno = 261 (0x105), region = 32  ;;  %368 = vmatprep.subr.bf16.mxu0 (!%p142_p9), %v492_v1  ;;  %376 = vmatprep.mubr.msk.bf16.mxu0 (!%p142_p9), %vm493_vm0, %v492_v1  ;;  %p166_p10 = scmp.lt.s32.totalorder (!%p142_p9), %s348_s28, 3  ;;  %v426_v4 = vld [vmem:[%s635_s1 + $0x18] sm:$0xff] (!%p142_p9)   ;;  %vm219_vm1 = vcmask (!%p142_p9), 523264   ;;  %v350_v6 = vld [vmem:[%s636_s2] ss:$0 sm:$0xff] (!%p142_p9) }
   0xf   : > { %369 = vmatpush3.bf16.msra.mxu0 (!%p142_p9), %v423_v0  ;;  %s162_s10 = sand.u32 (!%p142_p9), 1, %s482_s13   ;;  %s362_s25 = sshll.u32 (!%p142_p9), %s538_s16, 8  ;;  %vm264_vm2 = vcmask (!%p142_p9), 261120  }
  0x10   : > { %370 = vmatprep.subr.bf16.mxu0 (!%p142_p9), %v492_v1  ;;  %s347_s11 = sshll.u32 (!%p142_p9), %s162_s10, 4  ;;  %s593_s16 = scalar_lea.sflag (!%p142_p9), [#allocation3], %s162_s10 }
  0x11   : > { %s164_s20 = scalar_lea.vmem (!%p142_p9), [#allocation2], %s347_s11  ;;  %s494_s30 = smov (!%p142_p9), [#allocation2]  }
  0x12   : > { %s281_s24 = sshll.u32 (!%p142_p9), %s164_s20, 4  ;;  %s586_s24 = int_to_ptr.vmem [resolvable:$true] %s281_s24 }
  0x13   : > { %371 = vmatpush3.bf16.msra.mxu0 (!%p142_p9), %v424_v2  ;;  %s428_s29 = scalar_lea.vmem (!%p142_p9), %s586_s24, 256 }
  0x14   : > { %372 = vmatprep.subr.bf16.mxu0 (!%p142_p9), %v492_v1  ;;  %p429_p11 = scmp.ne.s32.totalorder (!%p142_p9), %s586_s24, %s428_s29 }
  0x15   : > { %s645_s28 = smov (!%p166_p10, %s348_s28), 3 }
  0x16   : > { %s349_s4 = sshll.u32 %s645_s28, 2  ;;  %s591_s28 = scalar_lea.hbm %s637_s3, %s362_s25 }
  0x17   : > { %s169_s7 = scalar_lea.vmem %s634_s0, %s349_s4  ;;  %373 = vmatpush3.bf16.msra.mxu0 %v425_v3  ;;  %p430_p12 = pnand %p429_p11, %p555_p5 }
  0x18   : > { %374 = vmatprep.subr.bf16.mxu0 %v492_v1  ;;  %v427_v5 = vld [vmem:[%s169_s7] sm:$0xff]   ;;  %s432_s4 = sshll.u32 %s494_s30, 4  ;;  %s433_s4 = int_to_ptr.vmem [resolvable:$false] %s432_s4 }
  0x19   : > { %p431_p13 = pneg %p430_p12  ;;  %s434_s5 = scalar_lea.vmem %s433_s4, 512 }
  0x1a   : > { %p435_p0 = scmp.lt.s32.totalorder %s586_s24, %s433_s4  ;;  %p436_p1 = scmp.lt.s32.totalorder %s434_s5, %s428_s29 }
  0x1b   : > { %375 = vmatpush3.bf16.msra.mxu0 %v426_v4 }
  0x1c   : > { %p437_p2 = por %p436_p1, %p435_p0 }
  0x1e   : > { %377 = vmatmul.mubr.msk.bf16.vlgmr.msra.gmra.mrb[0].mxu0 %vm219_vm1, %v427_v5  ;;  %p438_p3 = pnand %p437_p2, %p431_p13 }
  0xf1   : > { %v257_v7 = vpop.f32.mrb[0].mxu0 }
  0xf2   : > { %v258_v8 = vadd.f32 %v350_v6, %v257_v7  ;;  %v378_v9 = vpop.f32.mrb[1].mxu0 }
  0xf3   : > { %v260_v10 = vpop.f32.mrb[2].mxu0 }
  0xf4   : > { %265 = vst.msk [vmem:[%s164_s20] sm:$0xff] %vm264_vm2, %v258_v8  ;;  %v261_v11 = vadd.f32 %v350_v6, %v260_v10  ;;  %v379_v12 = vpop.f32.mrb[3].mxu0 }
  0xf6   : > { %266 = vst.msk [vmem:[%s164_s20 + $0x8] sm:$0xff] %vm264_vm2, %v261_v11 }
  0xf7   : > { %441 = shalt.err (!%p438_p3)
}
  0xf8   : > { %s442_s6 = scalar_lea.hbm %s591_s28, 256  ;;  %s446_s9 = scalar_lea.hbm %s637_s3, 512 }
  0xf9   : > { %p443_p4 = scmp.ne.s32.totalorder %s591_s28, %s442_s6  ;;  %p447_p9 = scmp.lt.u32.totalorder %s591_s28, %s637_s3 }
  0xfa   : > { %p448_p10 = scmp.lt.u32.totalorder %s446_s9, %s442_s6  ;;  %p450_p12 = scmp.lt.u32.totalorder %s442_s6, %s591_s28 }
  0xfb   : > { %p444_p7 = pnand %p443_p4, %p555_p5 }
  0xfc   : > { %p449_p11 = por %p448_p10, %p447_p9 }
  0xfd   : > { %p445_p8 = pneg %p444_p7 }
  0xfe   : > { %p451_p13 = por %p450_p12, %p449_p11 }
 0x100   : > { %p452_p0 = pnand %p451_p13, %p445_p8 }
 0x102   : > { %455 = shalt.err (!%p452_p0)
}
 0x103   : > { %s495_s17 = smov 128   ;;  %s496_s19 = smov 8  }
 0x104   : > { %380 = dma.vmem_to_hbm [thread:$0]  (%p555_p5), %s586_s24, 256, %s591_s28, %s593_s16, %s495_s17, %s495_s17, %s496_s19  }
 0x105 PF: > { %p386_p1 = scmp.ge.s32.totalorder %s490_s15, 2  ;;  %s296_s20 = sand.u32 1, %s478_s12  }
 0x106   : > { %s297_s25 = scalar_lea.sflag [#allocation3], %s296_s20 }
 0x107   : > { %p383_p2 = pnand %p386_p1, %p559_p6 }
 0x109   : > { %473 = dma.done.wait (!%p383_p2), %s297_s25, 256  }
 0x10a   : > { %475 = vsyncadd (!%p383_p2), %s297_s25, 4294967040  ;;  %p13_p3 = scmp.ge.s32.totalorder %s542_s18, 4   ;;  %s640_s12 = smov %s482_s13 }
 0x10b   : > { %s641_s13 = smov %s486_s14  ;;  %s642_s14 = smov %s553_s21 }
 0x10c   : > { %s643_s15 = smov %s542_s18  ;;  %15 = sbr.rel (!%p13_p3) target bundleno = 3 (0x3), region = 67 }
 0x113   :  { %302 = vsyncpa [#allocation3], 1 }
 0x114   :  { %304 = vsyncpa [#allocation3 + $0x1], 1 }

</bundles_post_ra>
